<compile_context>
chip_gen: v5e
topology: v5e:2x2
jax: 0.10.0
libtpu: 0.0.40
codegen_flags: <defaults>
</compile_context>

<pallas_src>
import functools

import jax
import jax.numpy as jnp
from jax.experimental import pallas as pl
from jax.experimental.pallas import tpu as pltpu

_NC_PAD = 128   # classes padded to a full lane width for dense stores
_BN_EPS = 1e-5


def _round_up(x, m):
    return (x + m - 1) // m * m


def _aux_kernel(x_ref, w1gb_ref, w2b2_ref, out_ref, h_scr, s1_scr,
                *, n_real, hw, dim, tn, nc_pad, chunk, unroll_limit=16):
    i = pl.program_id(0)
    n_pad, dhp = h_scr.shape

    @pl.when(i == 0)
    def _init():
        s1_scr[...] = jnp.zeros_like(s1_scr)

    # ---- global average pool as a spatial SUM (1/HW folded into BN eps) ----
    # Chunked along the lane axis; cast to f32 per chunk (x may be bf16).
    num_full = hw // chunk
    tail = hw - num_full * chunk
    pooled = jnp.zeros((tn, dim), jnp.float32)
    if num_full > 0:
        if num_full <= unroll_limit:
            for c in range(num_full):
                pooled = pooled + jnp.sum(
                    x_ref[:, :, c * chunk:(c + 1) * chunk].astype(jnp.float32),
                    axis=-1)
        else:
            def body(c, acc):
                s = pl.multiple_of(c * chunk, chunk)
                return acc + jnp.sum(
                    x_ref[:, :, pl.ds(s, chunk)].astype(jnp.float32), axis=-1)
            pooled = jax.lax.fori_loop(0, num_full, body, pooled)
    if tail > 0:
        pooled = pooled + jnp.sum(
            x_ref[:, :, num_full * chunk:hw].astype(jnp.float32), axis=-1)

    # ---- linear1 (dim -> dim/2, lane-padded). b1 dropped: a per-feature
    # constant cancels exactly in (h - mu) under training-mode BatchNorm. ----
    h = jnp.dot(pooled, w1gb_ref[0:dim, :],
                preferred_element_type=jnp.float32)               # (tn, dhp)

    # Mask tail rows of the (possibly out-of-bounds) last batch tile so they
    # contribute exactly zero to the batch statistics.
    if n_real % tn != 0:
        rows = i * tn + jax.lax.broadcasted_iota(jnp.int32, (tn, dhp), 0)
        h = jnp.where(rows < n_real, h, 0.0)

    row0 = pl.multiple_of(i * tn, tn)
    h_scr[pl.ds(row0, tn), :] = h
    s1_scr[...] += jnp.sum(h, axis=0, keepdims=True)

    @pl.when(i == pl.num_programs(0) - 1)
    def _finalize():
        inv_n = 1.0 / n_real
        mu = s1_scr[...] * inv_n                                  # (1, dhp)
        h_all = h_scr[...]                                        # (n_pad, dhp)

        # Two-pass variance straight from the resident h (no E[x^2]-E[x]^2
        # cancellation); masked so padded rows don't bias it.
        diff = h_all - mu
        if n_pad != n_real:
            rows = jax.lax.broadcasted_iota(jnp.int32, (n_pad, dhp), 0)
            diff = jnp.where(rows < n_real, diff, 0.0)
        var = jnp.sum(diff * diff, axis=0, keepdims=True) * inv_n

        # h is HW * (mean-pooled h); scaling eps by HW^2 makes this identical
        # to BN(eps=1e-5) applied to the mean-pooled activations.
        inv_std = jax.lax.rsqrt(var + _BN_EPS * float(hw) * float(hw))
        gamma = w1gb_ref[dim:dim + 1, :]                          # (1, dhp)
        beta = w1gb_ref[dim + 1:dim + 2, :]                       # (1, dhp)
        a = jnp.maximum((h_all - mu) * (inv_std * gamma) + beta, 0.0)

        # linear2 into lane-dense padded class dim; padded b2 lanes are -1e30
        # so they vanish in the softmax.
        w2 = w2b2_ref[0:dhp, :]                                   # (dhp, nc_pad)
        b2 = w2b2_ref[dhp:dhp + 1, :]                             # (1, nc_pad)
        logits = jnp.dot(a, w2, preferred_element_type=jnp.float32) + b2

        m = jnp.max(logits, axis=1, keepdims=True)
        e = jnp.exp(logits - m)
        probas = e / jnp.sum(e, axis=1, keepdims=True)            # exact divide

        # one lane-dense (n_pad, 2*128) output slab: [logits | probas]
        out_ref[:, 0:nc_pad] = logits
        out_ref[:, nc_pad:2 * nc_pad] = probas


def aux_net_v2_forward(x, params):
    """x: (N, C, H, W), C == dim, H == W. Returns (logits, probas).

    Matches Aux_net_v2.forward with BatchNorm1d in training mode (batch stats),
    which is what the PyTorch forward computes by default.
    """
    N, C, H, W = x.shape
    assert H == W, "module assumes square spatial (avg_pool2d kernel = W)"
    w1, b1, gamma, beta, w2, b2 = params  # b1 unused: cancels through training-mode BN
    dim, dim_half = w1.shape
    assert C == dim
    num_classes = w2.shape[1]
    assert num_classes <= _NC_PAD

    hw = H * W
    x_flat = x.reshape(N, C, hw)          # no pad, no dtype copy (kernel casts)
    xbytes = x_flat.dtype.itemsize

    # ---- batch tiling: ~8 MiB of x per buffer (double-buffered pipeline) ----
    tile_budget = 8 << 20
    tn = tile_budget // max(1, C * hw * xbytes)
    tn = max(8, min(256, (tn // 8) * 8))
    if tn >= N:
        tn = N                             # single tile covers the whole batch
    n_tiles = (N + tn - 1) // tn
    n_pad = n_tiles * tn

    # lane-reduce chunk width for the spatial sum
    chunk = min(128, hw)

    # pad dim/2 to a full lane width so h / batch stats / linear2-K are lane-dense
    dhp = _round_up(dim_half, 128)

    # ---- pack the small parameters into two DMAs ----
    w1p = jnp.zeros((dim, dhp), jnp.float32).at[:, :dim_half].set(
        w1.astype(jnp.float32))
    gamma_p = jnp.zeros((1, dhp), jnp.float32).at[:, :dim_half].set(
        jnp.reshape(gamma, (1, dim_half)).astype(jnp.float32))
    beta_p = jnp.zeros((1, dhp), jnp.float32).at[:, :dim_half].set(
        jnp.reshape(beta, (1, dim_half)).astype(jnp.float32))
    w1gb = jnp.concatenate([w1p, gamma_p, beta_p], axis=0)        # (dim+2, dhp)

    w2_pad = jnp.zeros((dhp, _NC_PAD), jnp.float32).at[:dim_half, :num_classes].set(
        w2.astype(jnp.float32))
    b2_pad = jnp.full((1, _NC_PAD), -1e30, jnp.float32).at[0, :num_classes].set(
        jnp.reshape(b2, (-1,)).astype(jnp.float32))
    w2b2 = jnp.concatenate([w2_pad, b2_pad], axis=0)              # (dhp+1, 128)

    kernel = functools.partial(
        _aux_kernel, n_real=N, hw=hw, dim=dim, tn=tn,
        nc_pad=_NC_PAD, chunk=chunk)

    # explicit VMEM budget: 2x x-tile + 2x params + h scratch + output slab
    needed = (2 * tn * C * hw * xbytes
              + 2 * (w1gb.size + w2b2.size) * 4
              + n_pad * dhp * 4
              + 2 * n_pad * 2 * _NC_PAD * 4
              + (4 << 20))
    vmem_limit = int(min(max(needed, 32 << 20), 48 << 20))

    out = pl.pallas_call(
        kernel,
        out_shape=jax.ShapeDtypeStruct((n_pad, 2 * _NC_PAD), jnp.float32),
        grid=(n_tiles,),
        in_specs=[
            pl.BlockSpec((tn, C, hw), lambda i: (i, 0, 0)),
            pl.BlockSpec(w1gb.shape, lambda i: (0, 0)),
            pl.BlockSpec(w2b2.shape, lambda i: (0, 0)),
        ],
        out_specs=pl.BlockSpec((n_pad, 2 * _NC_PAD), lambda i: (0, 0)),
        scratch_shapes=[
            pltpu.VMEM((n_pad, dhp), jnp.float32),   # per-sample h (HW-scaled)
            pltpu.VMEM((1, dhp), jnp.float32),       # sum(h) for batch mean
        ],
        compiler_params=pltpu.CompilerParams(
            dimension_semantics=("arbitrary",),      # BN stats couple batch tiles
            vmem_limit_bytes=vmem_limit),
    )(x_flat, w1gb, w2b2)

    logits = out[:N, :num_classes]
    probas = out[:N, _NC_PAD:_NC_PAD + num_classes]
    return logits, probas


def aux_net_v2_reference(x, params):
    """Pure-JAX reference replicating the PyTorch module exactly."""
    w1, b1, gamma, beta, w2, b2 = params
    N, C, H, W = x.shape
    pooled = jnp.mean(x.reshape(N, C, H * W).astype(jnp.float32), axis=-1)
    h = pooled @ w1 + b1
    mu = jnp.mean(h, axis=0, keepdims=True)
    var = jnp.mean((h - mu) ** 2, axis=0, keepdims=True)
    hn = (h - mu) / jnp.sqrt(var + _BN_EPS) * jnp.reshape(gamma, (1, -1)) \
        + jnp.reshape(beta, (1, -1))
    a = jnp.maximum(hn, 0.0)
    logits = a @ w2 + b2
    probas = jax.nn.softmax(logits, axis=1)
    return logits, probas


def init_params(key, dim, num_classes=10):
    """Deterministic init matching shapes of Aux_net_v2.__init__ (kaiming-normal weights)."""
    dim_half = dim // 2
    k1, k2, k3, k4 = jax.random.split(key, 4)
    w1 = jax.random.normal(k1, (dim, dim_half), jnp.float32) * jnp.sqrt(2.0 / dim)
    b1 = (jax.random.uniform(k2, (1, dim_half), jnp.float32) * 2.0 - 1.0) / jnp.sqrt(dim)
    gamma = jnp.ones((1, dim_half), jnp.float32)   # BatchNorm1d weight init
    beta = jnp.zeros((1, dim_half), jnp.float32)   # BatchNorm1d bias init
    w2 = jax.random.normal(k3, (dim_half, num_classes), jnp.float32) * jnp.sqrt(2.0 / dim_half)
    b2 = (jax.random.uniform(k4, (1, num_classes), jnp.float32) * 2.0 - 1.0) / jnp.sqrt(dim_half)
    return (w1, b1, gamma, beta, w2, b2)


if __name__ == "__main__":
    key = jax.random.PRNGKey(0)
    kx, kp = jax.random.split(key)

    N, dim, H, W, num_classes = 8, 32, 16, 16, 10
    x = jax.random.normal(kx, (N, dim, H, W), jnp.float32)
    params = init_params(kp, dim, num_classes)

    logits, probas = jax.jit(aux_net_v2_forward)(x, params)
    jax.block_until_ready((logits, probas))

    # sanity: shapes, exact softmax row sums, and agreement with the pure-JAX
    # reference of the PyTorch module (training-mode BatchNorm).
    ref_logits, ref_probas = aux_net_v2_reference(x, params)
    assert logits.shape == (N, num_classes) and probas.shape == (N, num_classes)
    assert bool(jnp.allclose(jnp.sum(probas, axis=1), 1.0, atol=1e-4))
    assert bool(jnp.allclose(logits, ref_logits, atol=2e-3, rtol=2e-3))
    assert bool(jnp.allclose(probas, ref_probas, atol=2e-3, rtol=2e-3))
    print("KERNEL_OK")
</pallas_src>

<mosaic_0001>
module attributes {stable_mosaic.version = 11 : i64} {
  func.func @_aux_kernel(%arg0: i32, %arg1: memref<8x32x256xf32, #tpu.memory_space<vmem>>, %arg2: memref<34x128xf32, #tpu.memory_space<vmem>>, %arg3: memref<129x128xf32, #tpu.memory_space<vmem>>, %arg4: memref<8x256xf32, #tpu.memory_space<vmem>>, %arg5: memref<8x128xf32, #tpu.memory_space<vmem>>, %arg6: memref<1x128xf32, #tpu.memory_space<vmem>>) attributes {dimension_semantics = [#tpu.dimension_semantics<arbitrary>], iteration_bounds = array<i64: 1>, scalar_prefetch = 0 : i64, scratch_operands = 2 : i64, tpu.core_type = #tpu.core_type<tc>, window_params = [{transform_indices = @transform_0, window_bounds = array<i64: 8, 32, 256>}, {pipeline_mode = #tpu.pipeline_mode<synchronous>, transform_indices = @transform_1, window_bounds = array<i64: 34, 128>}, {pipeline_mode = #tpu.pipeline_mode<synchronous>, transform_indices = @transform_2, window_bounds = array<i64: 129, 128>}, {pipeline_mode = #tpu.pipeline_mode<synchronous>, transform_indices = @transform_3, window_bounds = array<i64: 8, 256>}]} {
    %c0_i32 = arith.constant 0 : i32
    %0 = arith.cmpi eq, %arg0, %c0_i32 : i32
    %1 = arith.extui %0 : i1 to i32
    %c0_i32_0 = arith.constant 0 : i32
    %2 = arith.cmpi ne, %1, %c0_i32_0 : i32
    scf.if %2 {
      %cst_18 = arith.constant 0.000000e+00 : f32
      %24 = vector.broadcast %cst_18 : f32 to vector<1x128xf32>
      %c0_19 = arith.constant 0 : index
      %c0_20 = arith.constant 0 : index
      %25 = vector.load %arg6[%c0_19, %c0_20] : memref<1x128xf32, #tpu.memory_space<vmem>>, vector<1x128xf32>
      tpu.vector_store %arg6[%c0_19, %c0_20], %24 {strides = array<i32>} : memref<1x128xf32, #tpu.memory_space<vmem>>, vector<1x128xf32>,
    } else {
    }
    %cst = arith.constant 0.000000e+00 : f32
    %3 = vector.broadcast %cst : f32 to vector<8x32xf32>
    %c0 = arith.constant 0 : index
    %c0_1 = arith.constant 0 : index
    %c0_2 = arith.constant 0 : index
    %4 = vector.load %arg1[%c0, %c0_1, %c0_2] : memref<8x32x256xf32, #tpu.memory_space<vmem>>, vector<8x32x128xf32>
    %cst_3 = arith.constant dense<0.000000e+00> : vector<8x32xf32>
    %5 = vector.multi_reduction <add>, %4, %cst_3 [2] : vector<8x32x128xf32> to vector<8x32xf32>
    %6 = arith.addf %3, %5 : vector<8x32xf32>
    %c0_4 = arith.constant 0 : index
    %c0_5 = arith.constant 0 : index
    %c128 = arith.constant 128 : index
    %7 = vector.load %arg1[%c0_4, %c0_5, %c128] : memref<8x32x256xf32, #tpu.memory_space<vmem>>, vector<8x32x128xf32>
    %cst_6 = arith.constant dense<0.000000e+00> : vector<8x32xf32>
    %8 = vector.multi_reduction <add>, %7, %cst_6 [2] : vector<8x32x128xf32> to vector<8x32xf32>
    %9 = arith.addf %6, %8 : vector<8x32xf32>
    %c0_7 = arith.constant 0 : index
    %c0_8 = arith.constant 0 : index
    %10 = vector.load %arg2[%c0_7, %c0_8] : memref<34x128xf32, #tpu.memory_space<vmem>>, vector<32x128xf32>
    %cst_9 = arith.constant dense<0.000000e+00> : vector<8x128xf32>
    %11 = tpu.matmul %9, %10, %cst_9 {dimension_numbers = #tpu.dot_dimension_numbers<[1], [0], [0], [1], [0, 0, 1, 1], [], []>} : vector<8x32xf32>, vector<32x128xf32>, vector<8x128xf32> -> vector<8x128xf32>
    %c8_i32 = arith.constant 8 : i32
    %12 = arith.muli %arg0, %c8_i32 : i32
    %13 = tpu.assume_multiple %12, 8 : i32
    %14 = arith.index_cast %13 : i32 to index
    %c0_10 = arith.constant 0 : index
    %15 = vector.load %arg5[%14, %c0_10] : memref<8x128xf32, #tpu.memory_space<vmem>>, vector<8x128xf32>
    tpu.vector_store %arg5[%14, %c0_10], %11 {strides = array<i32>} : memref<8x128xf32, #tpu.memory_space<vmem>>, vector<8x128xf32>,
    %c0_11 = arith.constant 0 : index
    %c0_12 = arith.constant 0 : index
    %16 = vector.load %arg6[%c0_11, %c0_12] : memref<1x128xf32, #tpu.memory_space<vmem>>, vector<1x128xf32>
    %cst_13 = arith.constant dense<0.000000e+00> : vector<128xf32>
    %17 = vector.multi_reduction <add>, %11, %cst_13 [0] : vector<8x128xf32> to vector<128xf32>
    %18 = vector.shape_cast %17 : vector<128xf32> to vector<1x128xf32>
    %19 = arith.addf %16, %18 : vector<1x128xf32>
    %c0_14 = arith.constant 0 : index
    %c0_15 = arith.constant 0 : index
    %20 = vector.load %arg6[%c0_14, %c0_15] : memref<1x128xf32, #tpu.memory_space<vmem>>, vector<1x128xf32>
    tpu.vector_store %arg6[%c0_14, %c0_15], %19 {strides = array<i32>} : memref<1x128xf32, #tpu.memory_space<vmem>>, vector<1x128xf32>,
    %c0_i32_16 = arith.constant 0 : i32
    %21 = arith.cmpi eq, %arg0, %c0_i32_16 : i32
    %22 = arith.extui %21 : i1 to i32
    %c0_i32_17 = arith.constant 0 : i32
    %23 = arith.cmpi ne, %22, %c0_i32_17 : i32
    scf.if %23 {
      %c0_18 = arith.constant 0 : index
      %c0_19 = arith.constant 0 : index
      %24 = vector.load %arg6[%c0_18, %c0_19] : memref<1x128xf32, #tpu.memory_space<vmem>>, vector<1x128xf32>
      %cst_20 = arith.constant 1.250000e-01 : f32
      %25 = vector.broadcast %cst_20 : f32 to vector<1x128xf32>
      %26 = arith.mulf %24, %25 : vector<1x128xf32>
      %c0_21 = arith.constant 0 : index
      %c0_22 = arith.constant 0 : index
      %27 = vector.load %arg5[%c0_21, %c0_22] : memref<8x128xf32, #tpu.memory_space<vmem>>, vector<8x128xf32>
      %28 = vector.broadcast %26 : vector<1x128xf32> to vector<8x128xf32>
      %29 = arith.subf %27, %28 : vector<8x128xf32>
      %30 = arith.mulf %29, %29 : vector<8x128xf32>
      %cst_23 = arith.constant dense<0.000000e+00> : vector<128xf32>
      %31 = vector.multi_reduction <add>, %30, %cst_23 [0] : vector<8x128xf32> to vector<128xf32>
      %32 = vector.shape_cast %31 : vector<128xf32> to vector<1x128xf32>
      %cst_24 = arith.constant 1.250000e-01 : f32
      %33 = vector.broadcast %cst_24 : f32 to vector<1x128xf32>
      %34 = arith.mulf %32, %33 : vector<1x128xf32>
      %cst_25 = arith.constant 6.553600e-01 : f32
      %35 = vector.broadcast %cst_25 : f32 to vector<1x128xf32>
      %36 = arith.addf %34, %35 : vector<1x128xf32>
      %37 = math.rsqrt %36 : vector<1x128xf32>
      %c32 = arith.constant 32 : index
      %c0_26 = arith.constant 0 : index
      %38 = vector.load %arg2[%c32, %c0_26] : memref<34x128xf32, #tpu.memory_space<vmem>>, vector<1x128xf32>
      %c33 = arith.constant 33 : index
      %c0_27 = arith.constant 0 : index
      %39 = vector.load %arg2[%c33, %c0_27] : memref<34x128xf32, #tpu.memory_space<vmem>>, vector<1x128xf32>
      %40 = vector.broadcast %26 : vector<1x128xf32> to vector<8x128xf32>
      %41 = arith.subf %27, %40 : vector<8x128xf32>
      %42 = arith.mulf %37, %38 : vector<1x128xf32>
      %43 = vector.broadcast %42 : vector<1x128xf32> to vector<8x128xf32>
      %44 = arith.mulf %41, %43 : vector<8x128xf32>
      %45 = vector.broadcast %39 : vector<1x128xf32> to vector<8x128xf32>
      %46 = arith.addf %44, %45 : vector<8x128xf32>
      %cst_28 = arith.constant 0.000000e+00 : f32
      %47 = vector.broadcast %cst_28 : f32 to vector<8x128xf32>
      %48 = arith.maximumf %46, %47 : vector<8x128xf32>
      %c0_29 = arith.constant 0 : index
      %c0_30 = arith.constant 0 : index
      %49 = vector.load %arg3[%c0_29, %c0_30] : memref<129x128xf32, #tpu.memory_space<vmem>>, vector<128x128xf32>
      %c128_31 = arith.constant 128 : index
      %c0_32 = arith.constant 0 : index
      %50 = vector.load %arg3[%c128_31, %c0_32] : memref<129x128xf32, #tpu.memory_space<vmem>>, vector<1x128xf32>
      %cst_33 = arith.constant dense<0.000000e+00> : vector<8x128xf32>
      %51 = tpu.matmul %48, %49, %cst_33 {dimension_numbers = #tpu.dot_dimension_numbers<[1], [0], [0], [1], [0, 0, 1, 1], [], []>} : vector<8x128xf32>, vector<128x128xf32>, vector<8x128xf32> -> vector<8x128xf32>
      %52 = vector.broadcast %50 : vector<1x128xf32> to vector<8x128xf32>
      %53 = arith.addf %51, %52 : vector<8x128xf32>
      %cst_34 = arith.constant dense<0xFF800000> : vector<8xf32>
      %54 = vector.multi_reduction <maximumf>, %53, %cst_34 [1] : vector<8x128xf32> to vector<8xf32>
      %55 = vector.shape_cast %54 : vector<8xf32> to vector<8x1xf32>
      %56 = vector.broadcast %55 : vector<8x1xf32> to vector<8x128xf32>
      %57 = arith.subf %53, %56 : vector<8x128xf32>
      %58 = math.exp %57 : vector<8x128xf32>
      %cst_35 = arith.constant dense<0.000000e+00> : vector<8xf32>
      %59 = vector.multi_reduction <add>, %58, %cst_35 [1] : vector<8x128xf32> to vector<8xf32>
      %60 = vector.shape_cast %59 : vector<8xf32> to vector<8x1xf32>
      %61 = vector.broadcast %60 : vector<8x1xf32> to vector<8x128xf32>
      %62 = arith.divf %58, %61 : vector<8x128xf32>
      %c0_36 = arith.constant 0 : index
      %c0_37 = arith.constant 0 : index
      %63 = vector.load %arg4[%c0_36, %c0_37] : memref<8x256xf32, #tpu.memory_space<vmem>>, vector<8x128xf32>
      tpu.vector_store %arg4[%c0_36, %c0_37], %53 {strides = array<i32>} : memref<8x256xf32, #tpu.memory_space<vmem>>, vector<8x128xf32>,
      %c0_38 = arith.constant 0 : index
      %c128_39 = arith.constant 128 : index
      %64 = vector.load %arg4[%c0_38, %c128_39] : memref<8x256xf32, #tpu.memory_space<vmem>>, vector<8x128xf32>
      tpu.vector_store %arg4[%c0_38, %c128_39], %62 {strides = array<i32>} : memref<8x256xf32, #tpu.memory_space<vmem>>, vector<8x128xf32>,
    } else {
    }
    return
  }
  func.func @transform_0(%arg0: i32) -> (i32, i32, i32) {
    %c0_i32 = arith.constant 0 : i32
    %c0_i32_0 = arith.constant 0 : i32
    %c0_i32_1 = arith.constant 0 : i32
    return %arg0, %c0_i32, %c0_i32_0 : i32, i32, i32
  }
  func.func @transform_1(%arg0: i32) -> (i32, i32) {
    %c0_i32 = arith.constant 0 : i32
    %c0_i32_0 = arith.constant 0 : i32
    %c0_i32_1 = arith.constant 0 : i32
    return %c0_i32, %c0_i32_0 : i32, i32
  }
  func.func @transform_2(%arg0: i32) -> (i32, i32) {
    %c0_i32 = arith.constant 0 : i32
    %c0_i32_0 = arith.constant 0 : i32
    %c0_i32_1 = arith.constant 0 : i32
    return %c0_i32, %c0_i32_0 : i32, i32
  }
  func.func @transform_3(%arg0: i32) -> (i32, i32) {
    %c0_i32 = arith.constant 0 : i32
    %c0_i32_0 = arith.constant 0 : i32
    %c0_i32_1 = arith.constant 0 : i32
    return %c0_i32, %c0_i32_0 : i32, i32
  }
}

</mosaic_0001>

<bundles_post_ra>
// kernel: aux_net_v2_forward.1
= control target key start
LH: loop header
LB: loop body
LE: loop exit
PB: predicated region body
PF: predicated region fallthrough
CT: control target
= control target key end

     0   :  { %v311_v48 = vlaneseq  ;;  %vm316_vm0 = vcmask 130112   ;;  %vm320_vm1 = vcmask 195712   ;;  %vm324_vm2 = vcmask 261312   ;;  %s892_s0 = inlined_call_operand.vmem [shape: f32[8,32,256], index: 0, kind: input, shape index: {}]   ;;  %s893_s1 = inlined_call_operand.vmem [shape: f32[34,128], index: 1, kind: input, shape index: {}]   ;;  %s894_s2 = inlined_call_operand.vmem [shape: f32[129,128], index: 2, kind: input, shape index: {}]   ;;  %s895_s3 = inlined_call_operand.vmem [shape: f32[8,256], index: 3, kind: output, shape index: {}]  }
   0x1   :  { %v147_v0 = vld [vmem:[%s892_s0 + $0x8] sm:$0xff]  ;;  %v23_v1 = vld [vmem:[%s892_s0 + $0x40] sm:$0xff]  ;;  %v148_v3 = vld [vmem:[%s892_s0 + $0x18] sm:$0xff]  ;;  %vm375_vm3 = vcmask 1041409   ;;  %vm377_vm4 = vcmask 1042434   ;;  %vm379_vm5 = vcmask 1043459  }
   0x2   :  { %v19_v2 = vld [vmem:[%s892_s0] sm:$0xff]  ;;  %179 = vadd.xlane.f32.xlu2 %v147_v0  ;;  %59 = vadd.xlane.f32.xlu1 %v23_v1  ;;  %v24_v4 = vld [vmem:[%s892_s0 + $0x50] sm:$0xff]  ;;  %v152_v6 = vld [vmem:[%s892_s0 + $0x58] sm:$0xff]  ;;  %v702_v53 = vand.u32 127, %v311_v48  ;;  %vm381_vm6 = vcmask 1044484   ;;  %vm383_vm7 = vcmask 1045509  }
   0x3   :  { %51 = vadd.xlane.f32.xlu0 %v19_v2  ;;  %v20_v5 = vld [vmem:[%s892_s0 + $0x10] sm:$0xff]  ;;  %v21_v7 = vld [vmem:[%s892_s0 + $0x20] sm:$0xff]  ;;  %v151_v8 = vld [vmem:[%s892_s0 + $0x48] sm:$0xff]  ;;  %vm385_vm8 = vcmask 1046534   ;;  %vm387_vm9 = vcmask 1047559   ;;  %vm389_vm10 = vcmask 261120  }
   0x4   :  { %v27_v9 = vld [vmem:[%s892_s0 + $0x80] sm:$0xff]  ;;  %v28_v10 = vld [vmem:[%s892_s0 + $0x90] sm:$0xff]  ;;  %v153_v12 = vld [vmem:[%s892_s0 + $0x68] sm:$0xff]  ;;  %v705_v56 = vadd.s32 4294967288, %v702_v53 }
   0x5   :  { %v25_v11 = vld [vmem:[%s892_s0 + $0x60] sm:$0xff]  ;;  %v155_v13 = vld [vmem:[%s892_s0 + $0x88] sm:$0xff]  ;;  %v22_v15 = vld [vmem:[%s892_s0 + $0x30] sm:$0xff] }
   0x6   :  { %v149_v14 = vld [vmem:[%s892_s0 + $0x28] sm:$0xff]  ;;  %v26_v16 = vld [vmem:[%s892_s0 + $0x70] sm:$0xff]  ;;  %v156_v17 = vld [vmem:[%s892_s0 + $0x98] sm:$0xff] }
   0x7   :  { %v31_v18 = vld [vmem:[%s892_s0 + $0xc0] sm:$0xff]  ;;  %v32_v19 = vld [vmem:[%s892_s0 + $0xd0] sm:$0xff]  ;;  %v154_v21 = vld [vmem:[%s892_s0 + $0x78] sm:$0xff] }
   0x8   :  { %v29_v20 = vld [vmem:[%s892_s0 + $0xa0] sm:$0xff]  ;;  %v157_v22 = vld [vmem:[%s892_s0 + $0xa8] sm:$0xff]  ;;  %v150_v23 = vld [vmem:[%s892_s0 + $0x38] sm:$0xff] }
   0x9   :  { %v160_v24 = vld [vmem:[%s892_s0 + $0xd8] sm:$0xff]  ;;  %v30_v25 = vld [vmem:[%s892_s0 + $0xb0] sm:$0xff]  ;;  %v159_v26 = vld [vmem:[%s892_s0 + $0xc8] sm:$0xff] }
   0xa   :  { %181 = vadd.xlane.f32.xlu2 %v148_v3  ;;  %61 = vadd.xlane.f32.xlu1 %v24_v4  ;;  %v35_v27 = vld [vmem:[%s892_s0 + $0x100] sm:$0xff]  ;;  %v36_v28 = vld [vmem:[%s892_s0 + $0x110] sm:$0xff]  ;;  %v161_v30 = vld [vmem:[%s892_s0 + $0xe8] sm:$0xff] }
   0xb   :  { %53 = vadd.xlane.f32.xlu0 %v20_v5  ;;  %v33_v29 = vld [vmem:[%s892_s0 + $0xe0] sm:$0xff]  ;;  %v163_v31 = vld [vmem:[%s892_s0 + $0x108] sm:$0xff]  ;;  %v158_v32 = vld [vmem:[%s892_s0 + $0xb8] sm:$0xff] }
   0xc   :  { %v34_v33 = vld [vmem:[%s892_s0 + $0xf0] sm:$0xff]  ;;  %v37_v34 = vld [vmem:[%s892_s0 + $0x120] sm:$0xff]  ;;  %v164_v35 = vld [vmem:[%s892_s0 + $0x118] sm:$0xff] }
   0xd   :  { %v40_v36 = vld [vmem:[%s892_s0 + $0x150] sm:$0xff]  ;;  %v162_v37 = vld [vmem:[%s892_s0 + $0xf8] sm:$0xff]  ;;  %v39_v38 = vld [vmem:[%s892_s0 + $0x140] sm:$0xff] }
   0xe   :  { %v167_v39 = vld [vmem:[%s892_s0 + $0x148] sm:$0xff]  ;;  %v168_v40 = vld [vmem:[%s892_s0 + $0x158] sm:$0xff]  ;;  %v41_v42 = vld [vmem:[%s892_s0 + $0x160] sm:$0xff] }
   0xf   :  { %v165_v41 = vld [vmem:[%s892_s0 + $0x128] sm:$0xff]  ;;  %v43_v43 = vld [vmem:[%s892_s0 + $0x180] sm:$0xff]  ;;  %v38_v44 = vld [vmem:[%s892_s0 + $0x130] sm:$0xff] }
  0x10   :  { %v166_v50 = vld [vmem:[%s892_s0 + $0x138] sm:$0xff]  ;;  %v169_v51 = vld [vmem:[%s892_s0 + $0x168] sm:$0xff]  ;;  %v44_v52 = vld [vmem:[%s892_s0 + $0x190] sm:$0xff] }
  0x11   :  { %v172_v59 = vld [vmem:[%s892_s0 + $0x198] sm:$0xff]  ;;  %v42_v60 = vld [vmem:[%s892_s0 + $0x170] sm:$0xff]  ;;  %v171_v61 = vld [vmem:[%s892_s0 + $0x188] sm:$0xff] }
  0x12   :  { %189 = vadd.xlane.f32.xlu1 %v152_v6  ;;  %55 = vadd.xlane.f32.xlu2 %v21_v7  ;;  %v47_v6 = vld [vmem:[%s892_s0 + $0x1c0] sm:$0xff]  ;;  %v48_v7 = vld [vmem:[%s892_s0 + $0x1d0] sm:$0xff] }
  0x13   :  { %187 = vadd.xlane.f32.xlu0 %v151_v8 }
  0x1a   :  { %67 = vadd.xlane.f32.xlu1 %v27_v9  ;;  %69 = vadd.xlane.f32.xlu2 %v28_v10  ;;  %v45_v9 = vld [vmem:[%s892_s0 + $0x1a0] sm:$0xff] }
  0x1b   :  { %63 = vadd.xlane.f32.xlu0 %v25_v11 }
  0x22   :  { %191 = vadd.xlane.f32.xlu1 %v153_v12  ;;  %195 = vadd.xlane.f32.xlu2 %v155_v13 }
  0x23   :  { %183 = vadd.xlane.f32.xlu0 %v149_v14 }
  0x2a   :  { %57 = vadd.xlane.f32.xlu1 %v22_v15  ;;  %65 = vadd.xlane.f32.xlu2 %v26_v16  ;;  %v173_v15 = vld [vmem:[%s892_s0 + $0x1a8] sm:$0xff] }
  0x2b   :  { %197 = vadd.xlane.f32.xlu0 %v156_v17  ;;  %v175_v16 = vld [vmem:[%s892_s0 + $0x1c8] sm:$0xff]  ;;  %v170_v17 = vld [vmem:[%s892_s0 + $0x178] sm:$0xff] }
  0x32   :  { %75 = vadd.xlane.f32.xlu1 %v31_v18  ;;  %77 = vadd.xlane.f32.xlu2 %v32_v19  ;;  %v741_v18 = vadd.s32 4294967280, %v702_v53 }
  0x33   :  { %71 = vadd.xlane.f32.xlu0 %v29_v20 }
  0x3a   :  { %193 = vadd.xlane.f32.xlu1 %v154_v21  ;;  %199 = vadd.xlane.f32.xlu2 %v157_v22 }
  0x3b   :  { %185 = vadd.xlane.f32.xlu0 %v150_v23 }
  0x42   :  { %205 = vadd.xlane.f32.xlu1 %v160_v24  ;;  %73 = vadd.xlane.f32.xlu2 %v30_v25  ;;  %v46_v25 = vld [vmem:[%s892_s0 + $0x1b0] sm:$0xff] }
  0x43   :  { %203 = vadd.xlane.f32.xlu0 %v159_v26  ;;  %v49_v26 = vld [vmem:[%s892_s0 + $0x1e0] sm:$0xff] }
  0x4a   :  { %83 = vadd.xlane.f32.xlu1 %v35_v27  ;;  %85 = vadd.xlane.f32.xlu2 %v36_v28  ;;  %v176_v28 = vld [vmem:[%s892_s0 + $0x1d8] sm:$0xff] }
  0x4b   :  { %79 = vadd.xlane.f32.xlu0 %v33_v29 }
  0x52   :  { %207 = vadd.xlane.f32.xlu1 %v161_v30  ;;  %211 = vadd.xlane.f32.xlu2 %v163_v31 }
  0x53   :  { %201 = vadd.xlane.f32.xlu0 %v158_v32 }
  0x5a   :  { %81 = vadd.xlane.f32.xlu1 %v34_v33  ;;  %87 = vadd.xlane.f32.xlu2 %v37_v34 }
  0x5b   :  { %213 = vadd.xlane.f32.xlu0 %v164_v35 }
  0x62   :  { %93 = vadd.xlane.f32.xlu1 %v40_v36  ;;  %209 = vadd.xlane.f32.xlu2 %v162_v37  ;;  %v177_v36 = vld [vmem:[%s892_s0 + $0x1e8] sm:$0xff]  ;;  %v50_v37 = vld [vmem:[%s892_s0 + $0x1f0] sm:$0xff] }
  0x63   :  { %91 = vadd.xlane.f32.xlu0 %v39_v38  ;;  %v174_v38 = vld [vmem:[%s892_s0 + $0x1b8] sm:$0xff] }
  0x6a   :  { %219 = vadd.xlane.f32.xlu1 %v167_v39  ;;  %221 = vadd.xlane.f32.xlu2 %v168_v40 }
  0x6b   :  { %215 = vadd.xlane.f32.xlu0 %v165_v41 }
  0x72   :  { %95 = vadd.xlane.f32.xlu1 %v41_v42  ;;  %99 = vadd.xlane.f32.xlu2 %v43_v43 }
  0x73   :  { %89 = vadd.xlane.f32.xlu0 %v38_v44 }
  0x75   :  { %v180_v45 = vpop.xlane.xlu2 %179  ;;  %v60_v46 = vpop.xlane.xlu1 %59 }
  0x76   :  { %v52_v47 = vpop.xlane.xlu0 %51 }
  0x77   :  { %v243_v49 = vadd.f32 %v180_v45, %v52_v47  ;;  %v178_v45 = vld [vmem:[%s892_s0 + $0x1f8] sm:$0xff] }
  0x79   :  { %v313_v62 = vperm.slane %v243_v49, %v702_v53 }
  0x7a   :  { %217 = vadd.xlane.f32.xlu1 %v166_v50  ;;  %223 = vadd.xlane.f32.xlu2 %v169_v51 }
  0x7b   :  { %101 = vadd.xlane.f32.xlu0 %v44_v52 }
  0x7d   :  { %v182_v54 = vpop.xlane.xlu2 %181  ;;  %v62_v55 = vpop.xlane.xlu1 %61 }
  0x7e   :  { %v54_v57 = vpop.xlane.xlu0 %53 }
  0x7f   :  { %v244_v58 = vadd.f32 %v182_v54, %v54_v57 }
  0x81   :  { %v315_v63 = vperm.slane %v244_v58, %v705_v56 }
  0x82   :  { %229 = vadd.xlane.f32.xlu1 %v172_v59  ;;  %97 = vadd.xlane.f32.xlu2 %v42_v60 }
  0x83   :  { %v317_v0 = vsel %vm316_vm0, %v315_v63, %v313_v62  ;;  %227 = vadd.xlane.f32.xlu0 %v171_v61 }
  0x85   :  { %v190_v1 = vpop.xlane.xlu1 %189  ;;  %v56_v2 = vpop.xlane.xlu2 %55 }
  0x86   :  { %v248_v3 = vadd.f32 %v190_v1, %v62_v55  ;;  %v188_v4 = vpop.xlane.xlu0 %187 }
  0x87   :  { %v247_v5 = vadd.f32 %v188_v4, %v60_v46  ;;  %v772_v46 = vadd.s32 4294967272, %v702_v53 }
  0x88   :  { %v327_v8 = vperm.slane %v248_v3, %v705_v56 }
  0x89   :  { %v326_v10 = vperm.slane %v247_v5, %v702_v53 }
  0x8a   :  { %107 = vadd.xlane.f32.xlu1 %v47_v6  ;;  %109 = vadd.xlane.f32.xlu2 %v48_v7 }
  0x8b   :  { %v328_v11 = vsel %vm316_vm0, %v327_v8, %v326_v10  ;;  %103 = vadd.xlane.f32.xlu0 %v45_v9 }
  0x8d   :  { %v68_v12 = vpop.xlane.xlu1 %67  ;;  %v70_v13 = vpop.xlane.xlu2 %69 }
  0x8e   :  { %v64_v14 = vpop.xlane.xlu0 %63 }
  0x92   :  { %231 = vadd.xlane.f32.xlu1 %v173_v15  ;;  %235 = vadd.xlane.f32.xlu2 %v175_v16 }
  0x93   :  { %225 = vadd.xlane.f32.xlu0 %v170_v17 }
  0x95   :  { %v192_v19 = vpop.xlane.xlu1 %191  ;;  %v196_v20 = vpop.xlane.xlu2 %195 }
  0x96   :  { %v249_v21 = vadd.f32 %v192_v19, %v64_v14  ;;  %v251_v22 = vadd.f32 %v196_v20, %v68_v12  ;;  %v184_v23 = vpop.xlane.xlu0 %183 }
  0x97   :  { %v245_v24 = vadd.f32 %v184_v23, %v56_v2 }
  0x98   :  { %v329_v27 = vperm.slane %v249_v21, %v741_v18  ;;  %v333_v39 = vperm.slane %v251_v22, %v702_v53 }
  0x99   :  { %v319_v29 = vperm.slane %v245_v24, %v741_v18 }
  0x9a   :  { %v330_v30 = vsel %vm320_vm1, %v329_v27, %v328_v11  ;;  %105 = vadd.xlane.f32.xlu1 %v46_v25  ;;  %111 = vadd.xlane.f32.xlu2 %v49_v26 }
  0x9b   :  { %v321_v31 = vsel %vm320_vm1, %v319_v29, %v317_v0  ;;  %237 = vadd.xlane.f32.xlu0 %v176_v28 }
  0x9d   :  { %v58_v32 = vpop.xlane.xlu1 %57  ;;  %v66_v33 = vpop.xlane.xlu2 %65 }
  0x9e   :  { %v198_v34 = vpop.xlane.xlu0 %197 }
  0x9f   :  { %v252_v35 = vadd.f32 %v198_v34, %v70_v13 }
  0xa1   :  { %v334_v40 = vperm.slane %v252_v35, %v705_v56 }
  0xa2   :  { %239 = vadd.xlane.f32.xlu1 %v177_v36  ;;  %113 = vadd.xlane.f32.xlu2 %v50_v37 }
  0xa3   :  { %v335_v41 = vsel %vm316_vm0, %v334_v40, %v333_v39  ;;  %233 = vadd.xlane.f32.xlu0 %v174_v38 }
  0xa5   :  { %v76_v42 = vpop.xlane.xlu1 %75  ;;  %v78_v43 = vpop.xlane.xlu2 %77 }
  0xa6   :  { %v72_v44 = vpop.xlane.xlu0 %71 }
  0xab   :  { %241 = vadd.xlane.f32.xlu0 %v178_v45 }
  0xad   :  { %v194_v47 = vpop.xlane.xlu1 %193  ;;  %v200_v48 = vpop.xlane.xlu2 %199 }
  0xae   :  { %v250_v49 = vadd.f32 %v194_v47, %v66_v33  ;;  %v253_v50 = vadd.f32 %v200_v48, %v72_v44  ;;  %v186_v51 = vpop.xlane.xlu0 %185 }
  0xaf   :  { %v246_v52 = vadd.f32 %v186_v51, %v58_v32 }
  0xb0   :  { %v331_v54 = vperm.slane %v250_v49, %v772_v46  ;;  %v336_v55 = vperm.slane %v253_v50, %v741_v18 }
  0xb1   :  { %v323_v57 = vperm.slane %v246_v52, %v772_v46 }
  0xb2   :  { %v332_v58 = vsel %vm324_vm2, %v331_v54, %v330_v30  ;;  %v337_v59 = vsel %vm320_vm1, %v336_v55, %v335_v41 }
  0xb3   :  { %v325_v60 = vsel %vm324_vm2, %v323_v57, %v321_v31  ;;  %v278_v57 = vld [vmem:[%s893_s1 + $0x18] sm:$0xff] }
  0xb4   :  { %v376_v61 = vsel %vm375_vm3, %v332_v58, %v325_v60  ;;  %404 = vmatpush.msra.mxu0 %v278_v57  ;;  %v277_v60 = vld [vmem:[%s893_s1 + $0x10] sm:$0xff] }
  0xb5   :  { %v206_v62 = vpop.xlane.xlu1 %205  ;;  %v74_v63 = vpop.xlane.xlu2 %73  ;;  %v475_v57 = vld [vmem:[%s894_s2 + $0x70] sm:$0xff] }
  0xb6   :  { %v256_v0 = vadd.f32 %v206_v62, %v78_v43  ;;  %v204_v1 = vpop.xlane.xlu0 %203  ;;  %405 = vmatpush.msra.mxu0 %v277_v60  ;;  %v472_v60 = vld [vmem:[%s894_s2 + $0x58] sm:$0xff] }
  0xb7   :  { %v255_v2 = vadd.f32 %v204_v1, %v76_v42  ;;  %v275_v1 = vld [vmem:[%s893_s1] sm:$0xff] }
  0xb8   :  { %v341_v3 = vperm.slane %v256_v0, %v705_v56  ;;  %v276_v0 = vld [vmem:[%s893_s1 + $0x8] sm:$0xff] }
  0xb9   :  { %v340_v4 = vperm.slane %v255_v2, %v702_v53  ;;  %406 = vmatpush.msra.mxu0 %v276_v0  ;;  %v470_v0 = vld [vmem:[%s894_s2 + $0x48] sm:$0xff] }
  0xbb   :  { %v342_v5 = vsel %vm316_vm0, %v341_v3, %v340_v4  ;;  %407 = vmatpush.msra.mxu0 %v275_v1 }
  0xbd   :  { %v84_v6 = vpop.xlane.xlu1 %83  ;;  %v86_v7 = vpop.xlane.xlu2 %85 }
  0xbe   :  { %v80_v8 = vpop.xlane.xlu0 %79 }
  0xc5   :  { %v208_v9 = vpop.xlane.xlu1 %207  ;;  %v212_v10 = vpop.xlane.xlu2 %211 }
  0xc6   :  { %v257_v11 = vadd.f32 %v208_v9, %v80_v8  ;;  %v259_v12 = vadd.f32 %v212_v10, %v84_v6  ;;  %v202_v13 = vpop.xlane.xlu0 %201  ;;  %v537_v8 = vmov 0.0  }
  0xc7   :  { %v254_v14 = vadd.f32 %v202_v13, %v74_v63  ;;  %18 = vst [vmem:[#allocation3] sm:$0x1] %v537_v8  ;;  %v466_v8 = vld [vmem:[%s894_s2 + $0x28] sm:$0xff] }
  0xc8   :  { %v343_v15 = vperm.slane %v257_v11, %v741_v18  ;;  %v347_v25 = vperm.slane %v259_v12, %v702_v53 }
  0xc9   :  { %v338_v16 = vperm.slane %v254_v14, %v772_v46 }
  0xca   :  { %v344_v17 = vsel %vm320_vm1, %v343_v15, %v342_v5 }
  0xcb   :  { %v339_v19 = vsel %vm324_vm2, %v338_v16, %v337_v59 }
  0xcc   :  { %v378_v20 = vsel %vm377_vm4, %v339_v19, %v376_v61 }
  0xcd   :  { %v82_v21 = vpop.xlane.xlu1 %81  ;;  %v88_v22 = vpop.xlane.xlu2 %87 }
  0xce   :  { %v214_v23 = vpop.xlane.xlu0 %213 }
  0xcf   :  { %v260_v24 = vadd.f32 %v214_v23, %v86_v7 }
  0xd1   :  { %v348_v26 = vperm.slane %v260_v24, %v705_v56 }
  0xd3   :  { %v349_v27 = vsel %vm316_vm0, %v348_v26, %v347_v25 }
  0xd5   :  { %v94_v28 = vpop.xlane.xlu1 %93  ;;  %v210_v29 = vpop.xlane.xlu2 %209 }
  0xd6   :  { %v258_v30 = vadd.f32 %v210_v29, %v82_v21  ;;  %v92_v31 = vpop.xlane.xlu0 %91 }
  0xd8   :  { %v345_v32 = vperm.slane %v258_v30, %v772_v46 }
  0xda   :  { %v346_v33 = vsel %vm324_vm2, %v345_v32, %v344_v17 }
  0xdb   :  { %v380_v34 = vsel %vm379_vm5, %v346_v33, %v378_v20 }
  0xdd   :  { %v220_v35 = vpop.xlane.xlu1 %219  ;;  %v222_v36 = vpop.xlane.xlu2 %221 }
  0xde   :  { %v216_v37 = vpop.xlane.xlu0 %215  ;;  %v263_v62 = vadd.f32 %v220_v35, %v92_v31  ;;  %v264_v63 = vadd.f32 %v222_v36, %v94_v28 }
  0xdf   :  { %v261_v38 = vadd.f32 %v216_v37, %v88_v22 }
  0xe0   :  { %v354_v3 = vperm.slane %v263_v62, %v702_v53  ;;  %v355_v4 = vperm.slane %v264_v63, %v705_v56 }
  0xe1   :  { %v350_v39 = vperm.slane %v261_v38, %v741_v18 }
  0xe2   :  { %v356_v10 = vsel %vm316_vm0, %v355_v4, %v354_v3  ;;  %v468_v4 = vld [vmem:[%s894_s2 + $0x38] sm:$0xff] }
  0xe3   :  { %v351_v40 = vsel %vm320_vm1, %v350_v39, %v349_v27 }
  0xe5   :  { %v96_v41 = vpop.xlane.xlu1 %95  ;;  %v100_v42 = vpop.xlane.xlu2 %99 }
  0xe6   :  { %v90_v43 = vpop.xlane.xlu0 %89 }
  0xed   :  { %v218_v44 = vpop.xlane.xlu1 %217  ;;  %v224_v45 = vpop.xlane.xlu2 %223 }
  0xee   :  { %v262_v47 = vadd.f32 %v218_v44, %v90_v43  ;;  %v102_v48 = vpop.xlane.xlu0 %101  ;;  %v265_v2 = vadd.f32 %v224_v45, %v96_v41 }
  0xf0   :  { %v352_v49 = vperm.slane %v262_v47, %v772_v46  ;;  %v357_v6 = vperm.slane %v265_v2, %v741_v18  ;;  %v469_v2 = vld [vmem:[%s894_s2 + $0x40] sm:$0xff] }
  0xf2   :  { %v353_v50 = vsel %vm324_vm2, %v352_v49, %v351_v40  ;;  %v358_v12 = vsel %vm320_vm1, %v357_v6, %v356_v10  ;;  %v467_v6 = vld [vmem:[%s894_s2 + $0x30] sm:$0xff]  ;;  %v465_v10 = vld [vmem:[%s894_s2 + $0x20] sm:$0xff] }
  0xf3   :  { %v382_v51 = vsel %vm381_vm6, %v353_v50, %v380_v34 }
  0xf5   :  { %v230_v52 = vpop.xlane.xlu1 %229  ;;  %v98_v54 = vpop.xlane.xlu2 %97 }
  0xf6   :  { %v228_v55 = vpop.xlane.xlu0 %227  ;;  %v268_v20 = vadd.f32 %v230_v52, %v102_v48  ;;  %v415_v52 = vld [vmem:[#allocation3] sm:$0x1] }
  0xf7   :  { %v267_v21 = vadd.f32 %v228_v55, %v100_v42 }
  0xf8   :  { %v362_v27 = vperm.slane %v268_v20, %v705_v56 }
  0xf9   :  { %v361_v28 = vperm.slane %v267_v21, %v702_v53 }
  0xfb   :  { %v363_v35 = vsel %vm316_vm0, %v362_v27, %v361_v28  ;;  %v453_v28 = vld [vmem:[%s893_s1 + $0x20] sm:$0x1] }
  0xfd   :  { %v108_v58 = vpop.xlane.xlu1 %107  ;;  %v110_v61 = vpop.xlane.xlu2 %109 }
  0xfe   :  { %v104_v59 = vpop.xlane.xlu0 %103 }
 0x105   :  { %v232_v5 = vpop.xlane.xlu1 %231  ;;  %v236_v13 = vpop.xlane.xlu2 %235 }
 0x106   :  { %v226_v7 = vpop.xlane.xlu0 %225  ;;  %v269_v23 = vadd.f32 %v232_v5, %v104_v59  ;;  %v271_v31 = vadd.f32 %v236_v13, %v108_v58  ;;  %v474_v58 = vld [vmem:[%s894_s2 + $0x68] sm:$0xff]  ;;  %v473_v59 = vld [vmem:[%s894_s2 + $0x60] sm:$0xff] }
 0x107   :  { %v266_v9 = vadd.f32 %v226_v7, %v98_v54 }
 0x108   :  { %v364_v30 = vperm.slane %v269_v23, %v741_v18  ;;  %v368_v39 = vperm.slane %v271_v31, %v702_v53 }
 0x109   :  { %v359_v11 = vperm.slane %v266_v9, %v772_v46 }
 0x10a   :  { %v365_v38 = vsel %vm320_vm1, %v364_v30, %v363_v35 }
 0x10b   :  { %v360_v14 = vsel %vm324_vm2, %v359_v11, %v358_v12  ;;  %v464_v12 = vld [vmem:[%s894_s2 + $0x18] sm:$0xff] }
 0x10c   :  { %v384_v15 = vsel %vm383_vm7, %v360_v14, %v382_v51  ;;  %v463_v14 = vld [vmem:[%s894_s2 + $0x10] sm:$0xff] }
 0x10d   :  { %v106_v16 = vpop.xlane.xlu1 %105  ;;  %v112_v19 = vpop.xlane.xlu2 %111 }
 0x10e   :  { %v238_v17 = vpop.xlane.xlu0 %237 }
 0x10f   :  { %v272_v26 = vadd.f32 %v238_v17, %v110_v61  ;;  %v471_v61 = vld [vmem:[%s894_s2 + $0x50] sm:$0xff]  ;;  %v461_v17 = vld [vmem:[%s894_s2] sm:$0xff] }
 0x111   :  { %v369_v34 = vperm.slane %v272_v26, %v705_v56 }
 0x113   :  { %v370_v42 = vsel %vm316_vm0, %v369_v34, %v368_v39 }
 0x115   :  { %v240_v24 = vpop.xlane.xlu1 %239  ;;  %v114_v33 = vpop.xlane.xlu2 %113 }
 0x116   :  { %v234_v22 = vpop.xlane.xlu0 %233  ;;  %v273_v29 = vadd.f32 %v240_v24, %v112_v19 }
 0x117   :  { %v270_v25 = vadd.f32 %v234_v22, %v106_v16 }
 0x118   :  { %v371_v36 = vperm.slane %v273_v29, %v741_v18 }
 0x119   :  { %v366_v32 = vperm.slane %v270_v25, %v772_v46 }
 0x11a   :  { %v372_v56 = vsel %vm320_vm1, %v371_v36, %v370_v42  ;;  %v530_v36 = vld [vmem:[%s894_s2 + $0x80] ss:$0 sm:$0xff] }
 0x11b   :  { %v367_v41 = vsel %vm324_vm2, %v366_v32, %v365_v38  ;;  %v529_v32 = vld [vmem:[%s893_s1 + $0x21] ss:$0 sm:$0xff] }
 0x11c   :  { %v386_v18 = vsel %vm385_vm8, %v367_v41, %v384_v15  ;;  %v462_v15 = vld [vmem:[%s894_s2 + $0x8] sm:$0xff] }
 0x11e   :  { %v242_v37 = vpop.xlane.xlu0 %241 }
 0x11f   :  { %v274_v40 = vadd.f32 %v242_v37, %v114_v33 }
 0x121   :  { %v373_v43 = vperm.slane %v274_v40, %v772_v46  ;;  %v476_v46 = vld [vmem:[%s894_s2 + $0x78] sm:$0xff] }
 0x122   :  { %479 = vmatpush.msra.mxu1 %v476_v46 }
 0x123   :  { %v374_v44 = vsel %vm324_vm2, %v373_v43, %v372_v56 }
 0x124   :  { %v388_v45 = vsel %vm387_vm9, %v374_v44, %v386_v18  ;;  %480 = vmatpush.msra.mxu1 %v475_v57 }
 0x125   :  { %527 = vmatmul.msk.f32.vlgmr.msra.gmra.mxu0 %vm389_vm10, %v388_v45 }
 0x126   :  { %481 = vmatpush.msra.mxu1 %v474_v58 }
 0x128   :  { %482 = vmatpush.msra.mxu1 %v473_v59 }
 0x12a   :  { %483 = vmatpush.msra.mxu1 %v472_v60 }
 0x12c   :  { %484 = vmatpush.msra.mxu1 %v471_v61 }
 0x12e   :  { %485 = vmatpush.msra.mxu1 %v470_v0 }
 0x130   :  { %486 = vmatpush.msra.mxu1 %v469_v2 }
 0x132   :  { %487 = vmatpush.msra.mxu1 %v468_v4 }
 0x134   :  { %488 = vmatpush.msra.mxu1 %v467_v6 }
 0x136   :  { %489 = vmatpush.msra.mxu1 %v466_v8 }
 0x138   :  { %490 = vmatpush.msra.mxu1 %v465_v10 }
 0x13a   :  { %491 = vmatpush.msra.mxu1 %v464_v12 }
 0x13c   :  { %492 = vmatpush.msra.mxu1 %v463_v14 }
 0x13e   :  { %493 = vmatpush.msra.mxu1 %v462_v15 }
 0x140   :  { %494 = vmatpush.msra.mxu1 %v461_v17 }
 0x1a2   :  { %v409_v47 = vpop.f32.mrf.mxu0 }
 0x1a3   :  { %v416_v48 = vrot.slane %v409_v47, 4 }
 0x1a5   :  { %v417_v53 = vadd.f32 %v416_v48, %v409_v47 }
 0x1a7   :  { %v418_v49 = vrot.slane %v417_v53, 2 }
 0x1a9   :  { %v419_v50 = vadd.f32 %v418_v49, %v417_v53 }
 0x1ab   :  { %v420_v51 = vrot.slane %v419_v50, 1 }
 0x1ad   :  { %v421_v54 = vadd.f32 %v420_v51, %v419_v50 }
 0x1af   :  { %v422_v55 = vadd.f32 %v421_v54, %v415_v52 }
 0x1b1   :  { %423 = vst [vmem:[#allocation3] sm:$0x1] %v422_v55 }
 0x1b8   :  { %v427_v62 = vld [vmem:[#allocation3] sm:$0x1] }
 0x1b9   :  { %v428_v63 = vmul.f32 0.125, %v427_v62 }
 0x1bb   :  { %v431_v1 = vperm.slane %v428_v63, 0 }
 0x1bd   :  { %v433_v3 = vsub.f32 %v409_v47, %v431_v1 }
 0x1bf   :  { %v434_v5 = vmul.f32 %v433_v3, %v433_v3 }
 0x1c1   :  { %v435_v7 = vrot.slane %v434_v5, 4 }
 0x1c3   :  { %v436_v9 = vadd.f32 %v435_v7, %v434_v5 }
 0x1c5   :  { %v437_v11 = vrot.slane %v436_v9, 2 }
 0x1c7   :  { %v438_v13 = vadd.f32 %v437_v11, %v436_v9 }
 0x1c9   :  { %v439_v16 = vrot.slane %v438_v13, 1 }
 0x1cb   :  { %v440_v19 = vadd.f32 %v439_v16, %v438_v13 }
 0x1cd   :  { %v441_v20 = vmul.f32 0.125, %v440_v19 }
 0x1cf   :  { %v442_v21 = vadd.f32 0.65536, %v441_v20 }
 0x1d1   :  { %531 = vrsqrt.f32 %v442_v21  ;;  %vm449_vm12 = vweird.f32 %v442_v21 }
 0x1d7   :  { %v532_v22 = vpop.eup %531 }
 0x1d8   :  { %v444_v23 = vmul.f32 %v532_v22, %v442_v21  ;;  %vm450_vm11 = vweird.f32 %v532_v22 }
 0x1d9   :  { %vm451_vm13 = vmor %vm449_vm12, %vm450_vm11 }
 0x1da   :  { %v445_v24 = vmul.f32 %v532_v22, %v444_v23 }
 0x1dc   :  { %v446_v25 = vmul.f32 0.5, %v445_v24 }
 0x1de   :  { %v447_v26 = vsub.f32 1.5, %v446_v25 }
 0x1e0   :  { %v448_v27 = vmul.f32 %v532_v22, %v447_v26 }
 0x1e2   :  { %v452_v29 = vsel %vm451_vm13, %v532_v22, %v448_v27 }
 0x1e3   :  { %v455_v30 = vmul.f32 %v453_v28, %v452_v29 }
 0x1e5   :  { %v456_v31 = vperm.slane %v455_v30, 0 }
 0x1e7   :  { %v457_v33 = vmul.f32 %v456_v31, %v433_v3 }
 0x1e9   :  { %v459_v34 = vadd.f32 %v529_v32, %v457_v33 }
 0x1eb   :  { %v460_v35 = vmax.f32 %v459_v34, 0.0 }
 0x1ed   :  { %495 = vmatmul.f32.vlgmr.msra.gmra.mxu1 %v460_v35 }
 0x26a   :  { %v496_v37 = vpop.f32.mrf.mxu1 }
 0x26b   :  { %v497_v38 = vadd.f32 %v530_v36, %v496_v37 }
 0x26d   :  { %521 = vst [vmem:[%s895_s3] sm:$0xff] %v497_v38  ;;  %499 = vmax.xlane.f32.xlu1 %v497_v38 }
 0x2e0   :  { %v500_v39 = vpop.xlane.xlu1 %499 }
 0x2e1   :  { %v501_v40 = vsub.f32 %v497_v38, %v500_v39 }
 0x2e3   :  { %v502_v41 = vmul.f32 1.442695, %v501_v40 }
 0x2e5   :  { %533 = vpow2.f32 %v502_v41 }
 0x2eb   :  { %v534_v42 = vpop.eup %533 }
 0x2ec   :  { %504 = vadd.xlane.f32.xlu2 %v534_v42 }
 0x35f   :  { %v505_v43 = vpop.xlane.xlu2 %504 }
 0x360   :  { %535 = vrcp.f32 %v505_v43  ;;  %v517_v45 = vand.u32 2147483648, %v505_v43  ;;  %v515_v48 = vand.u32 2147483647, %v505_v43  ;;  %vm511_vm15 = vweird.f32 %v505_v43 }
 0x362   :  { %v518_v49 = vor.u32 1.1754944e-38, %v517_v45  ;;  %vm516_vm1 = vcmp.eq.f32.partialorder %v515_v48, 8.507059e+37 }
 0x366   :  { %v536_v56 = vpop.eup %535 }
 0x367   :  { %v507_v44 = vmul.f32 %v536_v56, %v505_v43  ;;  %vm512_vm14 = vweird.f32 %v536_v56 }
 0x368   :  { %vm513_vm0 = vmor %vm511_vm15, %vm512_vm14 }
 0x369   :  { %v508_v18 = vsub.f32 1.0, %v507_v44 }
 0x36b   :  { %v509_v47 = vmul.f32 %v536_v56, %v508_v18 }
 0x36d   :  { %v510_v53 = vadd.f32 %v536_v56, %v509_v47 }
 0x36f   :  { %v514_v50 = vsel %vm513_vm0, %v536_v56, %v510_v53 }
 0x370   :  { %v519_v51 = vsel %vm516_vm1, %v518_v49, %v514_v50 }
 0x371   :  { %v520_v52 = vmul.f32 %v534_v42, %v519_v51 }
 0x373   :  { %522 = vst [vmem:[%s895_s3 + $0x8] sm:$0xff] %v520_v52 }

</bundles_post_ra>
